<compile_context>
chip_gen: v5e
topology: v5e:2x2
jax: 0.10.0
libtpu: 0.0.40
codegen_flags: <defaults>
</compile_context>

<pallas_src>
import numpy as np
import jax
import jax.numpy as jnp
from jax.experimental import pallas as pl
from jax.experimental.pallas import tpu as pltpu

PI = float(np.pi)
TWO_PI = 2.0 * PI
LANES = 128


def _rigid_grid_kernel(params_ref, xT_ref, out_ref):
    # params (SMEM, f32[11]):
    #  [0..5]  rx0x', rx0y', rx1x', rx1y', rx2x', rx2y'   (Rx_k * 2*pi/period)
    #  [6..8]  a0, a1, a2        (wrapped offset phases)
    #  [9]     scale = peak_rate / 4.5
    #  [10]    bias  = 1.5 * peak_rate / 4.5
    x = xT_ref[0]          # (block_rows, 128)  -- fully packed vregs
    y = xT_ref[1]          # (block_rows, 128)

    r0 = jnp.cos(x * params_ref[0] + y * params_ref[1] - params_ref[6])
    r1 = jnp.cos(x * params_ref[2] + y * params_ref[3] - params_ref[7])
    r2 = jnp.cos(x * params_ref[4] + y * params_ref[5] - params_ref[8])

    out_ref[...] = (r0 + r1 + r2) * params_ref[9] + params_ref[10]


def rigid_grid_forward(X, period, orientation, peak_rate, offset, *, block_rows=512):
    """X: (N, 2) float32. Returns rate: (N, 1) float32."""
    X = jnp.asarray(X, jnp.float32)
    N = X.shape[0]
    assert block_rows % 8 == 0, "block_rows must be a multiple of 8"

    # ---- host-side parameter folding (mirrors torch __init__/forward) ----
    ori_scaling = 0.01
    sori = jnp.float32(orientation / ori_scaling) * jnp.float32(ori_scaling)
    period_f = jnp.float32(period)
    peak_f = jnp.float32(peak_rate)
    offset_v = jnp.asarray(offset, jnp.float32)            # (2,)

    thetas = sori + jnp.asarray([0.0, PI / 3.0, 2.0 * PI / 3.0], jnp.float32)
    # Rx_k = myMatCos*cos(-theta) + myMatSin*(-sin(-theta)) -> [cos(-t), -sin(-t)]
    rx = jnp.stack([jnp.cos(-thetas), -jnp.sin(-thetas)], axis=-1)   # (3, 2)

    k_ang = TWO_PI / period_f                               # 2*pi / period
    rx_scaled = (rx * k_ang).astype(jnp.float32)            # fold divide into Rx

    # wrapped offset phases a_k (scalar per component, computed once on host)
    d_off = rx @ offset_v                                   # (3,)
    xr_off = d_off * k_ang
    a_wrap = jnp.arctan2(jnp.sin(xr_off), jnp.cos(xr_off))  # (3,)

    scale = peak_f / jnp.float32(4.5)
    bias = jnp.float32(1.5) * peak_f / jnp.float32(4.5)

    params = jnp.concatenate(
        [rx_scaled.reshape(-1), a_wrap, jnp.stack([scale, bias])]
    ).astype(jnp.float32)                                    # (11,)

    # ---- lane/sublane-dense layout: (2, rows, 128) in, (rows, 128) out ----
    rows = -(-N // LANES)                                    # ceil(N / 128)
    if rows <= block_rows:
        br = rows                                            # single full block
        rows_padded = rows
    else:
        br = block_rows
        rows_padded = (-(-rows // br)) * br
    n_pad = rows_padded * LANES

    X_pad = jnp.pad(X, ((0, n_pad - N), (0, 0)))             # (n_pad, 2)
    xT3 = X_pad.T.reshape(2, rows_padded, LANES)              # (2, rows, 128)

    grid = (rows_padded // br,)
    out = pl.pallas_call(
        _rigid_grid_kernel,
        out_shape=jax.ShapeDtypeStruct((rows_padded, LANES), jnp.float32),
        grid_spec=pltpu.PrefetchScalarGridSpec(
            num_scalar_prefetch=0,
            grid=grid,
            in_specs=[
                pl.BlockSpec(memory_space=pltpu.MemorySpace.SMEM),        # params
                pl.BlockSpec((2, br, LANES), lambda i: (0, i, 0)),        # X tile
            ],
            out_specs=pl.BlockSpec((br, LANES), lambda i: (i, 0)),
        ),
        compiler_params=pltpu.CompilerParams(
            dimension_semantics=("parallel",)),
    )(params, xT3)

    # padded tail lanes compute garbage; slice them off here
    return out.reshape(n_pad)[:N].reshape(N, 1)


def _reference_forward(X, period, orientation, peak_rate, offset):
    """Pure numpy reference replicating the PyTorch forward exactly."""
    X = np.asarray(X, np.float32)
    sori = np.float32(orientation / 0.01) * np.float32(0.01)
    thetas = [sori, sori + PI / 3.0, sori + 2.0 * PI / 3.0]
    rxs = [np.array([[np.cos(-t)], [-np.sin(-t)]], np.float32) for t in thetas]
    offset = np.asarray(offset, np.float32)

    def wrap(v, p):
        vr = v / p * np.pi * 2
        return np.arctan2(np.sin(vr), np.cos(vr))

    cs = [wrap(X @ rx, period) for rx in rxs]
    avs = [wrap(offset @ rx, period) for rx in rxs]
    rate = (np.cos(cs[0] - avs[0]) + np.cos(cs[1] - avs[1]) +
            np.cos(cs[2] - avs[2]) + 1.5) / 4.5 * np.float32(peak_rate)
    return rate.astype(np.float32)


if __name__ == "__main__":
    key = jax.random.PRNGKey(0)

    # deterministic synthetic grid-cell parameters
    period = 0.5
    orientation = 0.3
    peak_rate = 2.0
    offset = [0.1, 0.2]

    # Test 1: small N, single block
    N1 = 256
    X1 = jax.random.uniform(key, (N1, 2), jnp.float32, minval=-5.0, maxval=5.0)
    rate1 = jax.block_until_ready(
        rigid_grid_forward(X1, period, orientation, peak_rate, offset))
    ref1 = _reference_forward(np.asarray(X1), period, orientation, peak_rate, offset)
    assert rate1.shape == (N1, 1)
    np.testing.assert_allclose(np.asarray(rate1), ref1, rtol=2e-4, atol=2e-4)

    # Test 2: non-multiple-of-128 N with a multi-block grid (exercises tiling/padding)
    N2 = 2000
    X2 = jax.random.uniform(jax.random.PRNGKey(1), (N2, 2), jnp.float32,
                            minval=-5.0, maxval=5.0)
    rate2 = jax.block_until_ready(
        rigid_grid_forward(X2, period, orientation, peak_rate, offset, block_rows=8))
    ref2 = _reference_forward(np.asarray(X2), period, orientation, peak_rate, offset)
    assert rate2.shape == (N2, 1)
    np.testing.assert_allclose(np.asarray(rate2), ref2, rtol=2e-4, atol=2e-4)

    print("KERNEL_OK")
</pallas_src>

<mosaic_0001>
module attributes {stable_mosaic.version = 11 : i64} {
  func.func @_rigid_grid_kernel(%arg0: i32, %arg1: memref<11xf32, #tpu.memory_space<smem>>, %arg2: memref<2x2x128xf32, #tpu.memory_space<vmem>>, %arg3: memref<2x128xf32, #tpu.memory_space<vmem>>) attributes {dimension_semantics = [#tpu.dimension_semantics<parallel>], iteration_bounds = array<i64: 1>, scalar_prefetch = 0 : i64, scratch_operands = 0 : i64, tpu.core_type = #tpu.core_type<tc>, window_params = [{transform_indices = @transform_0, window_bounds = array<i64: 11>}, {transform_indices = @transform_1, window_bounds = array<i64: 2, 2, 128>}, {transform_indices = @transform_2, window_bounds = array<i64: 2, 128>}]} {
    %c0 = arith.constant 0 : index
    %c0_0 = arith.constant 0 : index
    %c0_1 = arith.constant 0 : index
    %0 = vector.load %arg2[%c0, %c0_0, %c0_1] : memref<2x2x128xf32, #tpu.memory_space<vmem>>, vector<1x2x128xf32>
    %1 = vector.shape_cast %0 : vector<1x2x128xf32> to vector<2x128xf32>
    %c1 = arith.constant 1 : index
    %c0_2 = arith.constant 0 : index
    %c0_3 = arith.constant 0 : index
    %2 = vector.load %arg2[%c1, %c0_2, %c0_3] : memref<2x2x128xf32, #tpu.memory_space<vmem>>, vector<1x2x128xf32>
    %3 = vector.shape_cast %2 : vector<1x2x128xf32> to vector<2x128xf32>
    %c0_4 = arith.constant 0 : index
    %4 = memref.load %arg1[%c0_4] : memref<11xf32, #tpu.memory_space<smem>>
    %5 = vector.broadcast %4 : f32 to vector<2x128xf32>
    %6 = arith.mulf %1, %5 : vector<2x128xf32>
    %c1_5 = arith.constant 1 : index
    %7 = memref.load %arg1[%c1_5] : memref<11xf32, #tpu.memory_space<smem>>
    %8 = vector.broadcast %7 : f32 to vector<2x128xf32>
    %9 = arith.mulf %3, %8 : vector<2x128xf32>
    %10 = arith.addf %6, %9 : vector<2x128xf32>
    %c6 = arith.constant 6 : index
    %11 = memref.load %arg1[%c6] : memref<11xf32, #tpu.memory_space<smem>>
    %12 = vector.broadcast %11 : f32 to vector<2x128xf32>
    %13 = arith.subf %10, %12 : vector<2x128xf32>
    %14 = math.cos %13 : vector<2x128xf32>
    %c2 = arith.constant 2 : index
    %15 = memref.load %arg1[%c2] : memref<11xf32, #tpu.memory_space<smem>>
    %16 = vector.broadcast %15 : f32 to vector<2x128xf32>
    %17 = arith.mulf %1, %16 : vector<2x128xf32>
    %c3 = arith.constant 3 : index
    %18 = memref.load %arg1[%c3] : memref<11xf32, #tpu.memory_space<smem>>
    %19 = vector.broadcast %18 : f32 to vector<2x128xf32>
    %20 = arith.mulf %3, %19 : vector<2x128xf32>
    %21 = arith.addf %17, %20 : vector<2x128xf32>
    %c7 = arith.constant 7 : index
    %22 = memref.load %arg1[%c7] : memref<11xf32, #tpu.memory_space<smem>>
    %23 = vector.broadcast %22 : f32 to vector<2x128xf32>
    %24 = arith.subf %21, %23 : vector<2x128xf32>
    %25 = math.cos %24 : vector<2x128xf32>
    %c4 = arith.constant 4 : index
    %26 = memref.load %arg1[%c4] : memref<11xf32, #tpu.memory_space<smem>>
    %27 = vector.broadcast %26 : f32 to vector<2x128xf32>
    %28 = arith.mulf %1, %27 : vector<2x128xf32>
    %c5 = arith.constant 5 : index
    %29 = memref.load %arg1[%c5] : memref<11xf32, #tpu.memory_space<smem>>
    %30 = vector.broadcast %29 : f32 to vector<2x128xf32>
    %31 = arith.mulf %3, %30 : vector<2x128xf32>
    %32 = arith.addf %28, %31 : vector<2x128xf32>
    %c8 = arith.constant 8 : index
    %33 = memref.load %arg1[%c8] : memref<11xf32, #tpu.memory_space<smem>>
    %34 = vector.broadcast %33 : f32 to vector<2x128xf32>
    %35 = arith.subf %32, %34 : vector<2x128xf32>
    %36 = math.cos %35 : vector<2x128xf32>
    %37 = arith.addf %14, %25 : vector<2x128xf32>
    %38 = arith.addf %37, %36 : vector<2x128xf32>
    %c9 = arith.constant 9 : index
    %39 = memref.load %arg1[%c9] : memref<11xf32, #tpu.memory_space<smem>>
    %40 = vector.broadcast %39 : f32 to vector<2x128xf32>
    %41 = arith.mulf %38, %40 : vector<2x128xf32>
    %c10 = arith.constant 10 : index
    %42 = memref.load %arg1[%c10] : memref<11xf32, #tpu.memory_space<smem>>
    %43 = vector.broadcast %42 : f32 to vector<2x128xf32>
    %44 = arith.addf %41, %43 : vector<2x128xf32>
    %c0_6 = arith.constant 0 : index
    %c0_7 = arith.constant 0 : index
    %45 = vector.load %arg3[%c0_6, %c0_7] : memref<2x128xf32, #tpu.memory_space<vmem>>, vector<2x128xf32>
    tpu.vector_store %arg3[%c0_6, %c0_7], %44 {strides = array<i32>} : memref<2x128xf32, #tpu.memory_space<vmem>>, vector<2x128xf32>,
    return
  }
  func.func @transform_0(%arg0: i32) -> i32 {
    %c0_i32 = arith.constant 0 : i32
    %c0_i32_0 = arith.constant 0 : i32
    return %c0_i32 : i32
  }
  func.func @transform_1(%arg0: i32) -> (i32, i32, i32) {
    %c0_i32 = arith.constant 0 : i32
    %c0_i32_0 = arith.constant 0 : i32
    %c0_i32_1 = arith.constant 0 : i32
    return %c0_i32, %arg0, %c0_i32_0 : i32, i32, i32
  }
  func.func @transform_2(%arg0: i32) -> (i32, i32) {
    %c0_i32 = arith.constant 0 : i32
    %c0_i32_0 = arith.constant 0 : i32
    return %arg0, %c0_i32 : i32, i32
  }
}

</mosaic_0001>

<bundles_post_ra>
// kernel: tpu_custom_call.1
= control target key start
LH: loop header
LB: loop body
LE: loop exit
PB: predicated region body
PF: predicated region fallthrough
CT: control target
= control target key end

     0   :  { %7 = vsyncpa [#allocation5], 0  ;;  %s983_s0 = inlined_call_operand.hbm [shape: f32[11], index: 0, kind: input, shape index: {}]   ;;  %s984_s1 = inlined_call_operand.hbm [shape: f32[2,2,128], index: 1, kind: input, shape index: {}]   ;;  %s985_s2 = inlined_call_operand.hbm [shape: f32[2,128], index: 2, kind: output, shape index: {}]  }
   0x1   :  { %8 = vsyncpa [#allocation3], 0 }
   0x2   :  { %9 = vsyncpa [#allocation4], 0  ;;  %s15_s11 = sshll.u32 %s983_s0, 4  ;;  %s23_s14 = sshll.u32 %s984_s1, 4  ;;  %s16_s11 = int_to_ptr.hbm [resolvable:$true] %s15_s11  ;;  %s24_s14 = int_to_ptr.hbm [resolvable:$true] %s23_s14 }
   0x3   :  { %s660_s15 = smov [#allocation2]   ;;  %s661_s16 = smov [#allocation6]  }
   0x4   :  { %18 = dma.hbm_to_smem %s16_s11, 16, %s660_s15, [#allocation5]  }
   0x5   :  { %s25_s17 = sshll.u32 %s661_s16, 4  ;;  %s662_s18 = smov 32   ;;  %s26_s17 = int_to_ptr.vmem [resolvable:$true] %s25_s17 }
   0x6   :  { %s663_s19 = smov 2  }
   0x7   :  { %31 = dma.hbm_to_vmem [thread:$0]  %s24_s14, 64, %s26_s17, [#allocation3], %s662_s18, %s662_s18, %s663_s19  }
   0x8   :  { %654 = dma.done.wait [#allocation5], 16  }
   0x9   :  { %655 = vsyncadd [#allocation5], 4294967280 }
   0xa   :  { %656 = dma.done.wait [#allocation3], 64  }
   0xb   :  { %657 = vsyncadd [#allocation3], 4294967232 }
   0xc   :  { %40 = sfence }
   0xd   :  { %s44_s0 = sld [smem:[#allocation2]]  ;;  %v41_v0 = vld [vmem:[#allocation6] sm:$0x3]  ;;  %v43_v1 = vld [vmem:[#allocation6 + $0x2] sm:$0x3]  ;;  %s671_s29 = smov [#allocation7]  }
   0xe   :  { %s563_s20 = sld [smem:[#allocation2 + $0x1]]  ;;  %v664_v44 = vmov 683565275   ;;  %v665_v46 = vmov 2475754826   ;;  %s550_s30 = sshll.u32 %s671_s29, 4  ;;  %s551_s30 = int_to_ptr.vmem [resolvable:$true] %s550_s30 }
   0xf   :  { %s564_s21 = sld [smem:[#allocation2 + $0x6]]  ;;  %v666_v48 = vmov 2131351028   ;;  %v667_v50 = vmov 2102212464   ;;  %s552_s5 = sshll.u32 %s985_s2, 4  ;;  %s553_s5 = int_to_ptr.hbm [resolvable:$true] %s552_s5 }
  0x10   :  { %s568_s22 = sld [smem:[#allocation2 + $0x2]]  ;;  %v668_v52 = vmov 920167782   ;;  %v669_v59 = vmov 1326507024  }
  0x11   :  { %s569_s1 = sld [smem:[#allocation2 + $0x3]] }
  0x12   :  { %s570_s23 = sld [smem:[#allocation2 + $0x7]] }
  0x13   :  { %v45_v2 = vstv %s44_s0  ;;  %s574_s24 = sld [smem:[#allocation2 + $0x4]] }
  0x14   :  { %v46_v3 = vmul.f32 %v45_v2, %v41_v0  ;;  %v48_v4 = vstv %s563_s20  ;;  %s575_s25 = sld [smem:[#allocation2 + $0x5]] }
  0x15   :  { %v49_v5 = vmul.f32 %v48_v4, %v43_v1  ;;  %v52_v6 = vstv %s564_s21  ;;  %s576_s26 = sld [smem:[#allocation2 + $0x8]] }
  0x16   :  { %v209_v7 = vstv %s568_s22  ;;  %s580_s27 = sld [smem:[#allocation2 + $0x9]] }
  0x17   :  { %v50_v8 = vadd.f32 %v49_v5, %v46_v3  ;;  %v210_v9 = vmul.f32 %v209_v7, %v41_v0  ;;  %v212_v10 = vstv %s569_s1  ;;  %s581_s28 = sld [smem:[#allocation2 + $0xa]] }
  0x18   :  { %v213_v11 = vmul.f32 %v212_v10, %v43_v1  ;;  %v216_v13 = vstv %s570_s23 }
  0x19   :  { %v693_v12 = vsub.f32 %v50_v8, %v52_v6  ;;  %v373_v14 = vstv %s574_s24 }
  0x1a   :  { %v214_v15 = vadd.f32 %v213_v11, %v210_v9  ;;  %v374_v16 = vmul.f32 %v373_v14, %v41_v0  ;;  %v376_v17 = vstv %s575_s25 }
  0x1b   :  { %v54_v18 = vand.u32 2147483647, %v693_v12  ;;  %v57_v19 = vand.u32 2139095040, %v693_v12  ;;  %v377_v20 = vmul.f32 %v376_v17, %v43_v1  ;;  %v380_v29 = vstv %s576_s26 }
  0x1c   :  { %v697_v21 = vsub.f32 %v214_v15, %v216_v13 }
  0x1d   :  { %v58_v22 = vshrl.u32 %v57_v19, 23  ;;  %v61_v23 = vand.u32 8388607, %v54_v18  ;;  %v378_v26 = vadd.f32 %v377_v20, %v374_v16 }
  0x1e   :  { %v218_v24 = vand.u32 2147483647, %v697_v21  ;;  %v221_v25 = vand.u32 2139095040, %v697_v21 }
  0x1f   :  { %v565_v27 = vadd.s32 4294967169, %v58_v22  ;;  %v62_v28 = vor.u32 8388608, %v61_v23  ;;  %v707_v35 = vsub.f32 %v378_v26, %v380_v29 }
  0x20   :  { %v222_v30 = vshrl.u32 %v221_v25, 23  ;;  %v225_v34 = vand.u32 8388607, %v218_v24 }
  0x21   :  { %v64_v31 = vadd.s32 1, %v565_v27  ;;  %v703_v32 = vshll.u32 %v62_v28, 8  ;;  %v385_v42 = vand.u32 2139095040, %v707_v35 }
  0x22   :  { %v571_v33 = vadd.s32 4294967169, %v222_v30  ;;  %v226_v41 = vor.u32 8388608, %v225_v34 }
  0x23   :  { %vm65_vm0 = vcmp.gt.s32.totalorder %v64_v31, 0  ;;  %v710_v40 = vand.u32 65535, %v703_v32  ;;  %v104_v15 = vshrl.u32 %v703_v32, 16 }
  0x24   :  { %v66_v36 = vsel %vm65_vm0, %v64_v31, 0  ;;  %v228_v37 = vadd.s32 1, %v571_v33  ;;  %v733_v16 = vshll.u32 %v226_v41, 8 }
  0x25   :  { %v67_v38 = vshrl.u32 %v66_v36, 5  ;;  %v68_v39 = vand.u32 31, %v66_v36 }
  0x26   :  { %vm229_vm2 = vcmp.gt.s32.totalorder %v228_v37, 0 }
  0x27   :  { %v69_v43 = vsub.s32 32, %v68_v39  ;;  %v71_v45 = vshll.u32 %v664_v44, %v68_v39  ;;  %v74_v47 = vshll.u32 %v665_v46, %v68_v39  ;;  %v77_v49 = vshll.u32 %v666_v48, %v68_v39 }
  0x28   :  { %v80_v51 = vshll.u32 %v667_v50, %v68_v39  ;;  %v83_v53 = vshll.u32 %v668_v52, %v68_v39  ;;  %vm86_vm1 = vcmp.lt.s32.totalorder %v67_v38, 1  ;;  %vm87_vm3 = vcmp.lt.s32.totalorder %v67_v38, 2 }
  0x29   :  { %v70_v54 = vshrl.u32 %v664_v44, %v69_v43  ;;  %v72_v55 = vshrl.u32 %v665_v46, %v69_v43  ;;  %v75_v56 = vshrl.u32 %v666_v48, %v69_v43  ;;  %v78_v57 = vshrl.u32 %v667_v50, %v69_v43 }
  0x2a   :  { %v81_v58 = vshrl.u32 %v668_v52, %v69_v43  ;;  %v84_v60 = vshrl.u32 %v669_v59, %v69_v43  ;;  %vm89_vm4 = vcmp.lt.s32.totalorder %v67_v38, 4  ;;  %v230_v0 = vsel %vm229_vm2, %v228_v37, 0 }
  0x2b   :  { %v73_v61 = vor.u32 %v72_v55, %v71_v45  ;;  %v76_v62 = vor.u32 %v75_v56, %v74_v47  ;;  %v79_v63 = vor.u32 %v78_v57, %v77_v49  ;;  %vm88_vm5 = vcmp.lt.s32.totalorder %v67_v38, 3 }
  0x2c   :  { %v82_v1 = vor.u32 %v81_v58, %v80_v51  ;;  %v85_v2 = vor.u32 %v84_v60, %v83_v53  ;;  %v724_v3 = vand.u32 31, %v230_v0  ;;  %v740_v22 = vshrl.u32 %v230_v0, 5 }
  0x2d   :  { %v90_v4 = vsel %vm86_vm1, %v70_v54, %v73_v61  ;;  %v91_v5 = vsel %vm89_vm4, %v79_v63, 2102212464  ;;  %v94_v6 = vsel %vm86_vm1, %v73_v61, %v76_v62  ;;  %v98_v7 = vsel %vm86_vm1, %v76_v62, %v79_v63 }
  0x2e   :  { %v92_v8 = vsel %vm88_vm5, %v76_v62, %v91_v5  ;;  %v95_v9 = vsel %vm89_vm4, %v82_v1, 920167782  ;;  %v99_v10 = vsel %vm89_vm4, %v85_v2, 1326507024  ;;  %v730_v11 = vsub.s32 32, %v724_v3 }
  0x2f   :  { %v96_v13 = vsel %vm88_vm5, %v79_v63, %v95_v9  ;;  %v100_v14 = vsel %vm88_vm5, %v82_v1, %v99_v10  ;;  %v736_v17 = vsel %vm87_vm3, %v90_v4, %v92_v8  ;;  %v235_v28 = vshll.u32 %v664_v44, %v724_v3 }
  0x30   :  { %v97_v19 = vsel %vm87_vm3, %v94_v6, %v96_v13  ;;  %v101_v20 = vsel %vm87_vm3, %v98_v7, %v100_v14  ;;  %v236_v29 = vshrl.u32 %v665_v46, %v730_v11  ;;  %v238_v30 = vshll.u32 %v665_v46, %v724_v3 }
  0x31   :  { %v105_v23 = vand.u32 65535, %v101_v20  ;;  %v106_v25 = vshrl.u32 %v101_v20, 16  ;;  %v127_v26 = vand.u32 65535, %v97_v19  ;;  %v128_v27 = vshrl.u32 %v97_v19, 16 }
  0x32   :  { %v239_v31 = vshrl.u32 %v666_v48, %v730_v11  ;;  %v241_v37 = vshll.u32 %v666_v48, %v724_v3  ;;  %v237_v60 = vor.u32 %v236_v29, %v235_v28  ;;  %v670_v61 = vmov 0  }
  0x33   :  { %v107_v33 = vmul.u32 %v105_v23, %v710_v40  ;;  %v108_v34 = vmul.u32 %v106_v25, %v710_v40  ;;  %v109_v36 = vmul.u32 %v105_v23, %v104_v15  ;;  %v110_v38 = vmul.u32 %v106_v25, %v104_v15 }
  0x34   :  { %v129_v39 = vmul.u32 %v127_v26, %v710_v40  ;;  %v130_v41 = vmul.u32 %v128_v27, %v710_v40  ;;  %v131_v43 = vmul.u32 %v127_v26, %v104_v15  ;;  %v132_v51 = vmul.u32 %v128_v27, %v104_v15 }
  0x35   :  { %v111_v45 = vshll.u32 %v108_v34, 16  ;;  %v112_v47 = vshrl.u32 %v108_v34, 16  ;;  %v113_v49 = vshll.u32 %v109_v36, 16  ;;  %v114_v53 = vshrl.u32 %v109_v36, 16 }
  0x36   :  { %v133_v54 = vshll.u32 %v130_v41, 16  ;;  %v134_v55 = vshrl.u32 %v130_v41, 16  ;;  %v135_v56 = vshll.u32 %v131_v43, 16  ;;  %v136_v58 = vshrl.u32 %v131_v43, 16 }
  0x37   :  { %vm115_vm6 = vc.u32 %v107_v33, %v111_v45  ;;  %v117_v57 = vadd.s32 %v111_v45, %v107_v33  ;;  %v242_v40 = vshrl.u32 %v667_v50, %v730_v11  ;;  %v244_v2 = vshll.u32 %v667_v50, %v724_v3 }
  0x38   :  { %v116_v62 = vsel %vm115_vm6, 1, %v670_v61  ;;  %vm137_vm7 = vc.u32 %v129_v39, %v133_v54  ;;  %v139_v63 = vadd.s32 %v133_v54, %v129_v39  ;;  %v240_v6 = vor.u32 %v239_v31, %v238_v30 }
  0x39   :  { %v118_v0 = vadd.s32 %v116_v62, %v110_v38  ;;  %vm119_vm8 = vc.u32 %v117_v57, %v113_v49  ;;  %v138_v1 = vsel %vm137_vm7, 1, %v670_v61  ;;  %v243_v9 = vor.u32 %v242_v40, %v241_v37 }
  0x3a   :  { %v120_v4 = vsel %vm119_vm8, 1, %v670_v61  ;;  %v140_v5 = vadd.s32 %v138_v1, %v132_v51  ;;  %vm141_vm9 = vc.u32 %v139_v63, %v135_v56  ;;  %v245_v10 = vshrl.u32 %v668_v52, %v730_v11 }
  0x3b   :  { %v122_v7 = vadd.s32 %v120_v4, %v118_v0  ;;  %v142_v8 = vsel %vm141_vm9, 1, %v670_v61  ;;  %v247_v14 = vshll.u32 %v668_v52, %v724_v3  ;;  %v248_v15 = vshrl.u32 %v669_v59, %v730_v11 }
  0x3c   :  { %v144_v13 = vadd.s32 %v142_v8, %v140_v5  ;;  %vm250_vm10 = vcmp.lt.s32.totalorder %v740_v22, 1  ;;  %v771_v20 = vadd.s32 %v139_v63, %v135_v56  ;;  %v246_v23 = vor.u32 %v245_v10, %v244_v2 }
  0x3d   :  { %v123_v19 = vadd.s32 %v122_v7, %v112_v47  ;;  %vm252_vm11 = vcmp.lt.s32.totalorder %v740_v22, 3  ;;  %v249_v26 = vor.u32 %v248_v15, %v247_v14  ;;  %vm251_vm12 = vcmp.lt.s32.totalorder %v740_v22, 2 }
  0x3e   :  { %v145_v25 = vadd.s32 %v144_v13, %v134_v55  ;;  %vm253_vm13 = vcmp.lt.s32.totalorder %v740_v22, 4  ;;  %v258_v3 = vsel %vm250_vm10, %v237_v60, %v240_v6  ;;  %v386_v29 = vshrl.u32 %v385_v42, 23 }
  0x3f   :  { %v776_v27 = vadd.s32 %v123_v19, %v114_v53  ;;  %v259_v28 = vsel %vm253_vm13, %v246_v23, 920167782  ;;  %v267_v33 = vand.u32 65535, %v733_v16  ;;  %v268_v34 = vshrl.u32 %v733_v16, 16 }
  0x40   :  { %v146_v30 = vadd.s32 %v145_v25, %v136_v58  ;;  %v260_v31 = vsel %vm252_vm11, %v243_v9, %v259_v28  ;;  %v147_v36 = vmul.u32 %v703_v32, %v736_v17  ;;  %v262_v42 = vsel %vm250_vm10, %v240_v6, %v243_v9 }
  0x41   :  { %vm149_vm14 = vc.u32 %v776_v27, %v771_v20  ;;  %v261_v37 = vsel %vm251_vm12, %v258_v3, %v260_v31  ;;  %v263_v39 = vsel %vm253_vm13, %v249_v26, 1326507024  ;;  %v234_v45 = vshrl.u32 %v664_v44, %v730_v11 }
  0x42   :  { %v150_v38 = vadd.s32 1, %v146_v30  ;;  %v291_v41 = vand.u32 65535, %v261_v37  ;;  %v292_v43 = vshrl.u32 %v261_v37, 16  ;;  %v255_v32 = vsel %vm253_vm13, %v243_v9, 2102212464 }
  0x43   :  { %v264_v17 = vsel %vm252_vm11, %v246_v23, %v263_v39  ;;  %v577_v62 = vadd.s32 4294967169, %v386_v29  ;;  %v254_v11 = vsel %vm250_vm10, %v234_v45, %v237_v60  ;;  %v256_v1 = vsel %vm252_vm11, %v240_v6, %v255_v32 }
  0x44   :  { %v151_v47 = vsel %vm149_vm14, %v150_v38, %v146_v30  ;;  %v265_v49 = vsel %vm251_vm12, %v262_v42, %v264_v17  ;;  %v293_v51 = vmul.u32 %v291_v41, %v267_v33  ;;  %v294_v53 = vmul.u32 %v292_v43, %v267_v33 }
  0x45   :  { %v152_v54 = vadd.s32 %v151_v47, %v147_v36  ;;  %v269_v55 = vand.u32 65535, %v265_v49  ;;  %v270_v56 = vshrl.u32 %v265_v49, 16  ;;  %v295_v57 = vmul.u32 %v291_v41, %v268_v34 }
  0x46   :  { %v297_v58 = vshll.u32 %v294_v53, 16  ;;  %v296_v4 = vmul.u32 %v292_v43, %v268_v34  ;;  %v392_v15 = vadd.s32 1, %v577_v62  ;;  %v298_v23 = vshrl.u32 %v294_v53, 16 }
  0x47   :  { %v153_v63 = vadd.s32 536870912, %v152_v54  ;;  %v271_v40 = vmul.u32 %v269_v55, %v267_v33  ;;  %v272_v0 = vmul.u32 %v270_v56, %v267_v33  ;;  %v273_v2 = vmul.u32 %v269_v55, %v268_v34 }
  0x48   :  { %v299_v5 = vshll.u32 %v295_v57, 16  ;;  %v274_v8 = vmul.u32 %v270_v56, %v268_v34  ;;  %vm301_vm15 = vc.u32 %v293_v51, %v297_v58  ;;  %v303_v14 = vadd.s32 %v297_v58, %v293_v51 }
  0x49   :  { %v810_v7 = vshrl.u32 %v153_v63, 30  ;;  %v275_v9 = vshll.u32 %v272_v0, 16  ;;  %v277_v10 = vshll.u32 %v273_v2, 16  ;;  %v302_v13 = vsel %vm301_vm15, 1, %v670_v61 }
  0x4a   :  { %v300_v25 = vshrl.u32 %v295_v57, 16  ;;  %v304_v26 = vadd.s32 %v302_v13, %v296_v4  ;;  %vm305_vm1 = vc.u32 %v303_v14, %v299_v5  ;;  %v276_v28 = vshrl.u32 %v272_v0, 16 }
  0x4b   :  { %v155_v60 = vshll.u32 %v810_v7, 30  ;;  %vm279_vm0 = vc.u32 %v271_v40, %v275_v9  ;;  %v281_v19 = vadd.s32 %v275_v9, %v271_v40  ;;  %v278_v30 = vshrl.u32 %v273_v2, 16 }
  0x4c   :  { %v280_v6 = vsel %vm279_vm0, 1, %v670_v61  ;;  %v306_v33 = vsel %vm305_vm1, 1, %v670_v61  ;;  %vm393_vm3 = vcmp.gt.s32.totalorder %v392_v15, 0  ;;  %v821_v39 = vadd.s32 %v303_v14, %v299_v5 }
  0x4d   :  { %v815_v3 = vsub.s32 %v152_v54, %v155_v60  ;;  %v282_v29 = vadd.s32 %v280_v6, %v274_v8  ;;  %vm283_vm2 = vc.u32 %v281_v19, %v277_v10  ;;  %v308_v37 = vadd.s32 %v306_v33, %v304_v26 }
  0x4e   :  { %v284_v31 = vsel %vm283_vm2, 1, %v670_v61  ;;  %v394_v42 = vsel %vm393_vm3, %v392_v15, 0  ;;  %v257_v45 = vsel %vm251_vm12, %v254_v11, %v256_v1  ;;  %v382_v49 = vand.u32 2147483647, %v707_v35 }
  0x4f   :  { %vm157_vm4 = vcmp.lt.s32.totalorder %v815_v3, 0  ;;  %v158_v34 = vsub.s32 0, %v815_v3  ;;  %v286_v36 = vadd.s32 %v284_v31, %v282_v29  ;;  %v309_v41 = vadd.s32 %v308_v37, %v298_v23 }
  0x50   :  { %v396_v32 = vand.u32 31, %v394_v42  ;;  %v311_v53 = vmul.u32 %v733_v16, %v257_v45  ;;  %v389_v22 = vand.u32 8388607, %v382_v49  ;;  %v836_v57 = vshrl.u32 %v394_v42, 5 }
  0x51   :  { %v287_v38 = vadd.s32 %v286_v36, %v276_v28  ;;  %v159_v43 = vsel %vm157_vm4, %v158_v34, %v815_v3  ;;  %v310_v47 = vadd.s32 %v309_v41, %v300_v25  ;;  %vm56_vm2 = vcmp.lt.s32.totalorder %v693_v12, 0 }
  0x52   :  { %v160_v51 = vclz %v159_v43  ;;  %v832_v55 = vsub.s32 32, %v396_v32  ;;  %v399_v63 = vshll.u32 %v664_v44, %v396_v32  ;;  %v402_v11 = vshll.u32 %v665_v46, %v396_v32 }
  0x53   :  { %v826_v17 = vadd.s32 %v287_v38, %v278_v30  ;;  %v314_v54 = vadd.s32 1, %v310_v47  ;;  %v405_v0 = vshll.u32 %v666_v48, %v396_v32  ;;  %v408_v4 = vshll.u32 %v667_v50, %v396_v32 }
  0x54   :  { %v566_v58 = vadd.s32 4294967294, %v160_v51  ;;  %v400_v16 = vshrl.u32 %v665_v46, %v832_v55  ;;  %v403_v40 = vshrl.u32 %v666_v48, %v832_v55  ;;  %v406_v1 = vshrl.u32 %v667_v50, %v832_v55 }
  0x55   :  { %vm313_vm5 = vc.u32 %v826_v17, %v821_v39  ;;  %v409_v5 = vshrl.u32 %v668_v52, %v832_v55  ;;  %v411_v8 = vshll.u32 %v668_v52, %v396_v32  ;;  %v390_v9 = vor.u32 8388608, %v389_v22 }
  0x56   :  { %v315_v56 = vsel %vm313_vm5, %v314_v54, %v310_v47  ;;  %vm567_vm6 = vcmp.lt.s32.totalorder %v566_v58, 0  ;;  %v412_v13 = vshrl.u32 %v669_v59, %v832_v55  ;;  %v855_v48 = vor.u32 %v400_v16, %v399_v63 }
  0x57   :  { %v316_v62 = vadd.s32 %v315_v56, %v311_v53  ;;  %v410_v46 = vor.u32 %v409_v5, %v408_v4  ;;  %v857_v14 = vor.u32 %v403_v40, %v402_v11  ;;  %v859_v15 = vor.u32 %v406_v1, %v405_v0 }
  0x58   :  { %vm417_vm7 = vcmp.lt.s32.totalorder %v836_v57, 4  ;;  %v413_v60 = vor.u32 %v412_v13, %v411_v8  ;;  %vm414_vm8 = vcmp.lt.s32.totalorder %v836_v57, 1  ;;  %vm416_vm9 = vcmp.lt.s32.totalorder %v836_v57, 3 }
  0x59   :  { %v317_v2 = vadd.s32 536870912, %v316_v62  ;;  %v423_v52 = vsel %vm417_vm7, %v410_v46, 920167782  ;;  %v867_v19 = vshll.u32 %v390_v9, 8  ;;  %v163_v59 = vsel %vm567_vm6, 0, %v566_v58 }
  0x5a   :  { %vm415_vm10 = vcmp.lt.s32.totalorder %v836_v57, 2  ;;  %v422_v6 = vsel %vm414_vm8, %v855_v48, %v857_v14  ;;  %v424_v25 = vsel %vm416_vm9, %v859_v15, %v423_v52  ;;  %v426_v28 = vsel %vm414_vm8, %v857_v14, %v859_v15 }
  0x5b   :  { %v851_v10 = vshrl.u32 %v317_v2, 30  ;;  %v427_v29 = vsel %vm417_vm7, %v413_v60, 1326507024  ;;  %v148_v30 = vadd.s32 %v771_v20, %v776_v27  ;;  %v168_v31 = vsub.s32 4294967266, %v163_v59 }
  0x5c   :  { %v428_v33 = vsel %vm416_vm9, %v410_v46, %v427_v29  ;;  %v431_v34 = vand.u32 65535, %v867_v19  ;;  %v425_v37 = vsel %vm415_vm10, %v422_v6, %v424_v25  ;;  %v432_v38 = vshrl.u32 %v867_v19, 16 }
  0x5d   :  { %v319_v50 = vshll.u32 %v851_v10, 30  ;;  %v429_v42 = vsel %vm415_vm10, %v426_v28, %v428_v33  ;;  %v164_v41 = vsub.s32 32, %v163_v59  ;;  %v169_v20 = vadd.s32 127, %v168_v31 }
  0x5e   :  { %v433_v45 = vand.u32 65535, %v429_v42  ;;  %v434_v32 = vshrl.u32 %v429_v42, 16  ;;  %v456_v51 = vshrl.u32 %v425_v37, 16  ;;  %v165_v54 = vshll.u32 %v815_v3, %v163_v59 }
  0x5f   :  { %v320_v23 = vsub.s32 %v316_v62, %v319_v50  ;;  %v166_v56 = vshrl.u32 %v148_v30, %v164_v41  ;;  %v312_v22 = vadd.s32 %v821_v39, %v826_v17  ;;  %v455_v11 = vand.u32 65535, %v425_v37 }
  0x60   :  { %v436_v47 = vmul.u32 %v434_v32, %v431_v34  ;;  %v437_v53 = vmul.u32 %v433_v45, %v432_v38  ;;  %v435_v62 = vmul.u32 %v433_v45, %v431_v34  ;;  %v170_v16 = vshll.u32 %v169_v20, 23 }
  0x61   :  { %vm321_vm11 = vcmp.lt.s32.totalorder %v320_v23, 0  ;;  %v322_v26 = vsub.s32 0, %v320_v23  ;;  %v458_v0 = vmul.u32 %v456_v51, %v431_v34  ;;  %v438_v2 = vmul.u32 %v434_v32, %v432_v38 }
  0x62   :  { %v439_v63 = vshll.u32 %v436_v47, 16  ;;  %v441_v4 = vshll.u32 %v437_v53, 16  ;;  %v167_v5 = vor.u32 %v166_v56, %v165_v54  ;;  %v459_v13 = vmul.u32 %v455_v11, %v432_v38 }
  0x63   :  { %v323_v36 = vsel %vm321_vm11, %v322_v26, %v320_v23  ;;  %v171_v50 = vor.u32 4788187, %v170_v16  ;;  %v457_v17 = vmul.u32 %v455_v11, %v431_v34  ;;  %v461_v60 = vshll.u32 %v458_v0, 16 }
  0x64   :  { %v324_v43 = vclz %v323_v36  ;;  %vm443_vm13 = vc.u32 %v435_v62, %v439_v63  ;;  %v445_v3 = vadd.s32 %v439_v63, %v435_v62  ;;  %v440_v59 = vshrl.u32 %v436_v47, 16 }
  0x65   :  { %v444_v39 = vsel %vm443_vm13, 1, %v670_v61  ;;  %v398_v26 = vshrl.u32 %v664_v44, %v832_v55  ;;  %v460_v28 = vmul.u32 %v456_v51, %v432_v38  ;;  %v174_v29 = vcvt.s32.f32 %v167_v5 }
  0x66   :  { %v572_v27 = vadd.s32 4294967294, %v324_v43  ;;  %v446_v6 = vadd.s32 %v444_v39, %v438_v2  ;;  %vm447_vm14 = vc.u32 %v445_v3, %v441_v4  ;;  %v463_v33 = vshll.u32 %v459_v13, 16 }
  0x67   :  { %v172_v36 = vand.u32 2147483647, %v171_v50  ;;  %v419_v34 = vsel %vm417_vm7, %v859_v15, 2102212464  ;;  %vm465_vm15 = vc.u32 %v457_v17, %v461_v60  ;;  %v467_v37 = vadd.s32 %v461_v60, %v457_v17 }
  0x68   :  { %vm573_vm12 = vcmp.lt.s32.totalorder %v572_v27, 0  ;;  %v442_v42 = vshrl.u32 %v437_v53, 16  ;;  %v462_v43 = vshrl.u32 %v458_v0, 16  ;;  %v466_v45 = vsel %vm465_vm15, 1, %v670_v61 }
  0x69   :  { %v327_v58 = vsel %vm573_vm12, 0, %v572_v27  ;;  %v468_v32 = vadd.s32 %v466_v45, %v460_v28  ;;  %vm469_vm0 = vc.u32 %v467_v37, %v463_v33  ;;  %v418_v38 = vsel %vm414_vm8, %v398_v26, %v855_v48 }
  0x6a   :  { %v328_v40 = vsub.s32 32, %v327_v58  ;;  %v332_v1 = vsub.s32 4294967266, %v327_v58  ;;  %v329_v8 = vshll.u32 %v320_v23, %v327_v58  ;;  %v448_v23 = vsel %vm447_vm14, 1, %v670_v61 }
  0x6b   :  { %v450_v31 = vadd.s32 %v448_v23, %v446_v6  ;;  %v420_v20 = vsel %vm416_vm9, %v857_v14, %v419_v34  ;;  %v470_v15 = vsel %vm469_vm0, 1, %v670_v61  ;;  %v464_v27 = vshrl.u32 %v459_v13, 16 }
  0x6c   :  { %v330_v9 = vshrl.u32 %v312_v22, %v328_v40  ;;  %v333_v46 = vadd.s32 127, %v332_v1  ;;  %v472_v47 = vadd.s32 %v470_v15, %v468_v32  ;;  %v175_v51 = vmul.f32 %v174_v29, %v172_v36 }
  0x6d   :  { %v451_v41 = vadd.s32 %v450_v31, %v440_v59  ;;  %v471_v54 = vadd.s32 %v467_v37, %v463_v33  ;;  %v421_v22 = vsel %vm415_vm10, %v418_v38, %v420_v20  ;;  %vm220_vm3 = vcmp.lt.s32.totalorder %v697_v21, 0 }
  0x6e   :  { %v334_v52 = vshll.u32 %v333_v46, 23  ;;  %v331_v25 = vor.u32 %v330_v9, %v329_v8  ;;  %v473_v58 = vadd.s32 %v472_v47, %v462_v43  ;;  %v176_v63 = vxor.u32 2147483648, %v175_v51 }
  0x6f   :  { %v452_v53 = vadd.s32 %v451_v41, %v442_v42  ;;  %v475_v48 = vmul.u32 %v867_v19, %v421_v22  ;;  %vm918_vm4 = vcmp.le.f32.partialorder %v54_v18, 0.7853982  ;;  %vm926_vm5 = vcmp.le.f32.partialorder %v218_v24, 0.7853982 }
  0x70   :  { %v335_v30 = vor.u32 4788187, %v334_v52  ;;  %v338_v55 = vcvt.s32.f32 %v331_v25  ;;  %v474_v62 = vadd.s32 %v473_v58, %v464_v27  ;;  %v177_v57 = vsel %vm56_vm2, %v176_v63, %v175_v51 }
  0x71   :  { %vm477_vm1 = vc.u32 %v452_v53, %v471_v54  ;;  %v180_v18 = vsel %vm918_vm4, %v693_v12, %v177_v57  ;;  %v476_v25 = vadd.s32 %v471_v54, %v452_v53  ;;  %v178_v42 = vsub.s32 4, %v810_v7 }
  0x72   :  { %v336_v44 = vand.u32 2147483647, %v335_v30  ;;  %v478_v11 = vadd.s32 1, %v474_v62  ;;  %v182_v5 = vmul.f32 %v180_v18, %v180_v18  ;;  %v342_v51 = vsub.s32 4, %v851_v10 }
  0x73   :  { %v179_v15 = vsel %vm56_vm2, %v178_v42, %v810_v7  ;;  %vm384_vm8 = vcmp.lt.s32.totalorder %v707_v35, 0  ;;  %vm958_vm9 = vcmp.le.f32.partialorder %v382_v49, 0.7853982  ;;  %vm197_vm0 = vweird.f32 %v693_v12 }
  0x74   :  { %v339_v56 = vmul.f32 %v338_v55, %v336_v44  ;;  %v479_v61 = vsel %vm477_vm1, %v478_v11, %v474_v62  ;;  %v190_v46 = vmul.f32 -0.00019511016, %v182_v5  ;;  %v183_v17 = vmul.f32 -0.001358992, %v182_v5 }
  0x75   :  { %v480_v40 = vadd.s32 %v479_v61, %v475_v48  ;;  %v181_v22 = vsel %vm918_vm4, 0, %v179_v15  ;;  %v343_v48 = vsel %vm220_vm3, %v342_v51, %v851_v10  ;;  %vm361_vm1 = vweird.f32 %v697_v21 }
  0x76   :  { %v340_v14 = vxor.u32 2147483648, %v339_v56  ;;  %v191_v60 = vadd.f32 0.008332121, %v190_v46  ;;  %v184_v26 = vadd.f32 0.041655596, %v183_v17  ;;  %v198_v16 = vand.u32 3, %v181_v22 }
  0x77   :  { %v481_v1 = vadd.s32 536870912, %v480_v40  ;;  %v345_v57 = vsel %vm926_vm5, 0, %v343_v48 }
  0x78   :  { %v341_v0 = vsel %vm220_vm3, %v340_v14, %v339_v56  ;;  %v192_v23 = vmul.f32 %v191_v60, %v182_v5  ;;  %v185_v41 = vmul.f32 %v184_v26, %v182_v5  ;;  %vm200_vm10 = vcmp.eq.s32.totalorder %v198_v16, 0 }
  0x79   :  { %v938_v2 = vsel %vm926_vm5, %v697_v21, %v341_v0  ;;  %v940_v4 = vshrl.u32 %v481_v1, 30  ;;  %vm203_vm11 = vcmp.eq.s32.totalorder %v198_v16, 2  ;;  %vm199_vm14 = vcmp.lt.s32.totalorder %v198_v16, 2 }
  0x7a   :  { %v346_v8 = vmul.f32 %v938_v2, %v938_v2  ;;  %v193_v43 = vadd.f32 -0.16666654, %v192_v23  ;;  %v186_v27 = vadd.f32 -0.4999988, %v185_v41  ;;  %vm525_vm5 = vweird.f32 %v707_v35 }
  0x7b   :  { %v483_v24 = vshll.u32 %v940_v4, 30  ;;  %v506_v1 = vsub.s32 4, %v940_v4 }
  0x7c   :  { %v354_v13 = vmul.f32 -0.00019511016, %v346_v8  ;;  %v347_v52 = vmul.f32 -0.001358992, %v346_v8  ;;  %v194_v47 = vmul.f32 %v193_v43, %v182_v5  ;;  %v187_v62 = vmul.f32 %v186_v27, %v182_v5 }
  0x7d   :  { %v484_v9 = vsub.s32 %v480_v40, %v483_v24  ;;  %v542_v27 = vstv %s581_s28 }
  0x7e   :  { %v355_v59 = vadd.f32 0.008332121, %v354_v13  ;;  %v348_v28 = vadd.f32 0.041655596, %v347_v52  ;;  %v195_v63 = vadd.f32 1.0, %v194_v47  ;;  %v188_v0 = vadd.f32 1.0, %v187_v62 }
  0x7f   :  { %vm485_vm6 = vcmp.lt.s32.totalorder %v484_v9, 0  ;;  %v486_v3 = vsub.s32 0, %v484_v9 }
  0x80   :  { %v356_v30 = vmul.f32 %v355_v59, %v346_v8  ;;  %v349_v45 = vmul.f32 %v348_v28, %v346_v8  ;;  %v196_v10 = vmul.f32 %v195_v63, %v180_v18  ;;  %v204_v13 = vxor.u32 2147483648, %v188_v0 }
  0x81   :  { %v487_v50 = vsel %vm485_vm6, %v486_v3, %v484_v9  ;;  %v507_v18 = vsel %vm384_vm8, %v506_v1, %v940_v4 }
  0x82   :  { %v488_v39 = vclz %v487_v50  ;;  %v357_v44 = vadd.f32 -0.16666654, %v356_v30  ;;  %v350_v53 = vadd.f32 -0.4999988, %v349_v45  ;;  %v201_v3 = vxor.u32 2147483648, %v196_v10 }
  0x84   :  { %v578_v6 = vadd.s32 4294967294, %v488_v39  ;;  %v358_v54 = vmul.f32 %v357_v44, %v346_v8  ;;  %v351_v7 = vmul.f32 %v350_v53, %v346_v8 }
  0x86   :  { %vm579_vm7 = vcmp.lt.s32.totalorder %v578_v6, 0  ;;  %v359_v14 = vadd.f32 1.0, %v358_v54  ;;  %v352_v49 = vadd.f32 1.0, %v351_v7 }
  0x87   :  { %v491_v29 = vsel %vm579_vm7, 0, %v578_v6  ;;  %v202_v6 = vsel %vm200_vm10, %v188_v0, %v201_v3 }
  0x88   :  { %v492_v31 = vsub.s32 32, %v491_v29  ;;  %v493_v33 = vshll.u32 %v484_v9, %v491_v29  ;;  %v496_v36 = vsub.s32 4294967266, %v491_v29  ;;  %v360_v24 = vmul.f32 %v359_v14, %v938_v2 }
  0x89   :  { %v362_v9 = vand.u32 3, %v345_v57  ;;  %v368_v39 = vxor.u32 2147483648, %v352_v49  ;;  %v509_v2 = vsel %vm958_vm9, 0, %v507_v18 }
  0x8a   :  { %v494_v34 = vshrl.u32 %v476_v25, %v492_v31  ;;  %v497_v37 = vadd.s32 127, %v496_v36  ;;  %v365_v50 = vxor.u32 2147483648, %v360_v24  ;;  %v205_v25 = vsel %vm203_vm11, %v204_v13, %v196_v10 }
  0x8b   :  { %vm364_vm12 = vcmp.eq.s32.totalorder %v362_v9, 0  ;;  %vm367_vm13 = vcmp.eq.s32.totalorder %v362_v9, 2  ;;  %vm363_vm15 = vcmp.lt.s32.totalorder %v362_v9, 2  ;;  %v526_v29 = vand.u32 3, %v509_v2 }
  0x8c   :  { %v495_v55 = vor.u32 %v494_v34, %v493_v33  ;;  %v498_v32 = vshll.u32 %v497_v37, 23  ;;  %v366_v26 = vsel %vm364_vm12, %v352_v49, %v365_v50  ;;  %v369_v23 = vsel %vm367_vm13, %v368_v39, %v360_v24 }
  0x8d   :  { %v206_v33 = vsel %vm199_vm14, %v202_v6, %v205_v25  ;;  %v370_v36 = vsel %vm363_vm15, %v366_v26, %v369_v23  ;;  %vm531_vm2 = vcmp.eq.s32.totalorder %v526_v29, 2  ;;  %vm528_vm3 = vcmp.eq.s32.totalorder %v526_v29, 0 }
  0x8e   :  { %v499_v38 = vor.u32 4788187, %v498_v32  ;;  %v502_v20 = vcvt.s32.f32 %v495_v55  ;;  %v207_v42 = vsel %vm197_vm0, nan, %v206_v33  ;;  %v371_v41 = vsel %vm361_vm1, nan, %v370_v36 }
  0x8f   :  { %vm527_vm4 = vcmp.lt.s32.totalorder %v526_v29, 2  ;;  %v536_v12 = vadd.f32 %v371_v41, %v207_v42 }
  0x90   :  { %v500_v56 = vand.u32 2147483647, %v499_v38 }
  0x92   :  { %v503_v58 = vmul.f32 %v502_v20, %v500_v56  ;;  %v539_v20 = vstv %s580_s27 }
  0x94   :  { %v504_v61 = vxor.u32 2147483648, %v503_v58 }
  0x96   :  { %v505_v40 = vsel %vm384_vm8, %v504_v61, %v503_v58 }
  0x97   :  { %v508_v5 = vsel %vm958_vm9, %v707_v35, %v505_v40 }
  0x98   :  { %v510_v8 = vmul.f32 %v508_v5, %v508_v5 }
  0x9a   :  { %v511_v46 = vmul.f32 -0.001358992, %v510_v8  ;;  %v518_v19 = vmul.f32 -0.00019511016, %v510_v8 }
  0x9c   :  { %v512_v17 = vadd.f32 0.041655596, %v511_v46  ;;  %v519_v60 = vadd.f32 0.008332121, %v518_v19 }
  0x9e   :  { %v513_v52 = vmul.f32 %v512_v17, %v510_v8  ;;  %v520_v59 = vmul.f32 %v519_v60, %v510_v8 }
  0xa0   :  { %v514_v28 = vadd.f32 -0.4999988, %v513_v52  ;;  %v521_v4 = vadd.f32 -0.16666654, %v520_v59 }
  0xa2   :  { %v515_v30 = vmul.f32 %v514_v28, %v510_v8  ;;  %v522_v31 = vmul.f32 %v521_v4, %v510_v8 }
  0xa4   :  { %v516_v34 = vadd.f32 1.0, %v515_v30  ;;  %v523_v37 = vadd.f32 1.0, %v522_v31 }
  0xa6   :  { %v524_v43 = vmul.f32 %v523_v37, %v508_v5  ;;  %v532_v45 = vxor.u32 2147483648, %v516_v34 }
  0xa8   :  { %v529_v44 = vxor.u32 2147483648, %v524_v43  ;;  %v533_v55 = vsel %vm531_vm2, %v532_v45, %v524_v43 }
  0xaa   :  { %v530_v32 = vsel %vm528_vm3, %v516_v34, %v529_v44 }
  0xab   :  { %v534_v38 = vsel %vm527_vm4, %v530_v32, %v533_v55 }
  0xac   :  { %v535_v21 = vsel %vm525_vm5, nan, %v534_v38 }
  0xad   :  { %v537_v15 = vadd.f32 %v536_v12, %v535_v21 }
  0xaf   :  { %v540_v47 = vmul.f32 %v539_v20, %v537_v15 }
  0xb1   :  { %v543_v51 = vadd.f32 %v542_v27, %v540_v47 }
  0xb3   :  { %544 = vst [vmem:[#allocation7] sm:$0x3] %v543_v51 }
  0xb4   :  { %555 = dma.vmem_to_hbm [thread:$0]  %s551_s30, 32, %s553_s5, [#allocation4]  }
  0xb5   :  { %658 = dma.done.wait [#allocation4], 32  }
  0xb6   :  { %659 = vsyncadd [#allocation4], 4294967264 }
  0xb7   :  { %560 = vsyncpa [#allocation3], 1 }
  0xb8   :  { %561 = vsyncpa [#allocation4], 1 }
  0xb9   :  { %562 = vsyncpa [#allocation5], 1 }

</bundles_post_ra>
